<compile_context>
chip_gen: v7x
topology: tpu7x:2x2x1
jax: 0.10.0
libtpu: 0.0.40
codegen_flags: <defaults>
</compile_context>

<pallas_src>
import functools

import jax
import jax.numpy as jnp
from jax import lax
from jax.experimental import pallas as pl
from jax.experimental.pallas import tpu as pltpu


def _round_up(x, m):
    return (x + m - 1) // m * m


# Largest 128-aligned K kept fully resident in one VMEM tile (fused-K path).
# bf16 tiles at tm=256, tn=512, tk=2048 are ~7 MiB double-buffered — fits the
# scoped-VMEM default on v5e/v6e/v7x with plenty of headroom.
_K_FUSE_MAX = 2048


def _linear_relu_fused_kernel(x_ref, w_ref, b_ref, o_ref):
    # x_ref: (tm, Kp) bf16   w_ref: (tn, Kp) bf16   b_ref: (1, tn) f32
    # o_ref: (tm, tn) f32
    # Contract the last dim of both operands; no weight transpose materialized
    # (MXU consumes the transposed RHS natively).
    acc = lax.dot_general(
        x_ref[...], w_ref[...],
        dimension_numbers=(((1,), (1,)), ((), ())),
        preferred_element_type=jnp.float32,
    )
    o_ref[...] = jnp.maximum(acc + b_ref[...], 0.0)


def _linear_relu_ktiled_kernel(x_ref, w_ref, b_ref, o_ref):
    # Large-K fallback: accumulate straight into the resident f32 output block
    # (no accumulator scratch, no finalize copy).
    k = pl.program_id(2)
    part = lax.dot_general(
        x_ref[...], w_ref[...],
        dimension_numbers=(((1,), (1,)), ((), ())),
        preferred_element_type=jnp.float32,
    )

    @pl.when(k == 0)
    def _():
        o_ref[...] = part

    @pl.when(k != 0)
    def _():
        o_ref[...] += part

    @pl.when(k == pl.num_programs(2) - 1)
    def _():
        o_ref[...] = jnp.maximum(o_ref[...] + b_ref[...], 0.0)


@functools.partial(jax.jit, static_argnames=("compute_dtype",))
def linear_relu(x, weight, bias, *, compute_dtype=jnp.bfloat16):
    """relu(x @ weight.T + bias) with PyTorch-layout weight (Cout, Cin)."""
    M, K = x.shape
    N = weight.shape[0]
    out_dtype = x.dtype

    # ---- tile selection ------------------------------------------------------
    tm = min(256, _round_up(M, 16))          # 16-sublane aligned (bf16 packing)
    tn = min(512, _round_up(N, 128))         # lane-dense output
    Kp = _round_up(K, 128)
    fuse_k = Kp <= _K_FUSE_MAX
    tk = Kp if fuse_k else 512
    Kp = _round_up(K, tk)
    Mp = _round_up(M, tm)
    Np = _round_up(N, tn)
    # Keep at least 2 blocks on the parallel axes so v7x can use both TCs.
    while (Mp // tm) * (Np // tn) < 2 and tn >= 256:
        tn //= 2
        Np = _round_up(N, tn)

    # ---- bf16 cast for the MXU; pad only when not already tile-aligned ------
    xp = x.astype(compute_dtype)
    wp = weight.astype(compute_dtype)
    bp = bias.astype(jnp.float32).reshape(1, N)
    if (Mp, Kp) != (M, K):
        xp = jnp.pad(xp, ((0, Mp - M), (0, Kp - K)))   # zero K-edges: safe reduction
    if (Np, Kp) != (N, K):
        wp = jnp.pad(wp, ((0, Np - N), (0, Kp - K)))
    if Np != N:
        bp = jnp.pad(bp, ((0, 0), (0, Np - N)))

    compiler_params = pltpu.CompilerParams(
        dimension_semantics=("parallel", "parallel") if fuse_k
        else ("parallel", "parallel", "arbitrary"),
        vmem_limit_bytes=32 * 1024 * 1024,   # safe on v5e/v6e/v7x; covers max tiles
    )

    if fuse_k:
        out = pl.pallas_call(
            _linear_relu_fused_kernel,
            out_shape=jax.ShapeDtypeStruct((Mp, Np), jnp.float32),
            grid=(Mp // tm, Np // tn),
            in_specs=[
                pl.BlockSpec((tm, Kp), lambda i, j: (i, 0)),   # x
                pl.BlockSpec((tn, Kp), lambda i, j: (j, 0)),   # W (Cout, Cin)
                pl.BlockSpec((1, tn), lambda i, j: (0, j)),    # bias slice
            ],
            out_specs=pl.BlockSpec((tm, tn), lambda i, j: (i, j)),
            compiler_params=compiler_params,
        )(xp, wp, bp)
    else:
        out = pl.pallas_call(
            _linear_relu_ktiled_kernel,
            out_shape=jax.ShapeDtypeStruct((Mp, Np), jnp.float32),
            grid=(Mp // tm, Np // tn, Kp // tk),
            in_specs=[
                pl.BlockSpec((tm, tk), lambda i, j, k: (i, k)),   # x
                pl.BlockSpec((tn, tk), lambda i, j, k: (j, k)),   # W (Cout, Cin)
                pl.BlockSpec((1, tn), lambda i, j, k: (0, j)),    # bias slice
            ],
            out_specs=pl.BlockSpec((tm, tn), lambda i, j, k: (i, j)),
            compiler_params=compiler_params,
        )(xp, wp, bp)

    if (Mp, Np) != (M, N):
        out = out[:M, :N]
    return out.astype(out_dtype)


def custom_model_forward(x, weight, bias):
    """CustomModel.forward with a tiny-problem guard (pad/launch overhead
    dominates below ~one MXU tile of useful work)."""
    M, K = x.shape
    N = weight.shape[0]
    if M * K * N < 8 * 128 * 128:
        return jnp.maximum(x @ weight.T + bias, 0.0)
    return linear_relu(x, weight, bias)


def reference(x, weight, bias):
    return jnp.maximum(x @ weight.T + bias, 0.0)


if __name__ == "__main__":
    key = jax.random.PRNGKey(0)

    # --- Small case matching the module spec: Linear(3, 16) + ReLU ----------
    kx, kw, kb = jax.random.split(key, 3)
    B, C_IN, C_OUT = 2, 3, 16
    x = jax.random.normal(kx, (B, C_IN), dtype=jnp.float32)
    bound = 1.0 / (C_IN ** 0.5)
    weight = jax.random.uniform(kw, (C_OUT, C_IN), minval=-bound, maxval=bound,
                                dtype=jnp.float32)
    bias = jax.random.uniform(kb, (C_OUT,), minval=-bound, maxval=bound,
                              dtype=jnp.float32)

    out = jax.block_until_ready(linear_relu(x, weight, bias))   # Pallas path
    ref = reference(x, weight, bias)
    assert out.shape == (B, C_OUT)
    assert jnp.allclose(out, ref, atol=2e-2, rtol=2e-2)         # bf16 MXU inputs
    # Guarded entry point (takes the plain-XLA path at this tiny size).
    out_g = jax.block_until_ready(custom_model_forward(x, weight, bias))
    assert jnp.allclose(out_g, ref, atol=1e-5, rtol=1e-5)

    # --- Medium case: exercises the fused-K path, grid = (2, 1) -------------
    kx2, kw2, kb2 = jax.random.split(jax.random.PRNGKey(1), 3)
    M2, K2, N2 = 512, 384, 512
    x2 = jax.random.normal(kx2, (M2, K2), dtype=jnp.float32)
    w2 = jax.random.normal(kw2, (N2, K2), dtype=jnp.float32) * 0.05
    b2 = jax.random.normal(kb2, (N2,), dtype=jnp.float32)
    out2 = jax.block_until_ready(linear_relu(x2, w2, b2))
    ref2 = reference(x2, w2, b2)
    assert out2.shape == (M2, N2)
    assert jnp.allclose(out2, ref2, atol=3e-2, rtol=3e-2)

    # --- Large-K case: exercises the K-tiled path, grid = (1, 2, 5) ---------
    kx3, kw3, kb3 = jax.random.split(jax.random.PRNGKey(2), 3)
    M3, K3, N3 = 256, 2560, 256
    x3 = jax.random.normal(kx3, (M3, K3), dtype=jnp.float32)
    w3 = jax.random.normal(kw3, (N3, K3), dtype=jnp.float32) * 0.02
    b3 = jax.random.normal(kb3, (N3,), dtype=jnp.float32)
    out3 = jax.block_until_ready(linear_relu(x3, w3, b3))
    ref3 = reference(x3, w3, b3)
    assert out3.shape == (M3, N3)
    assert jnp.allclose(out3, ref3, atol=5e-2, rtol=5e-2)

    print("KERNEL_OK")
</pallas_src>

<mosaic_0001>
module attributes {stable_mosaic.version = 11 : i64} {
  func.func @_linear_relu_fused_kernel(%arg0: i32, %arg1: i32, %arg2: memref<16x128xbf16, #tpu.memory_space<vmem>>, %arg3: memref<128x128xbf16, #tpu.memory_space<vmem>>, %arg4: memref<1x128xf32, #tpu.memory_space<vmem>>, %arg5: memref<16x128xf32, #tpu.memory_space<vmem>>) attributes {dimension_semantics = [#tpu.dimension_semantics<parallel>, #tpu.dimension_semantics<parallel>], iteration_bounds = array<i64: 1, 1>, scalar_prefetch = 0 : i64, scratch_operands = 0 : i64, tpu.core_type = #tpu.core_type<tc>, window_params = [{transform_indices = @transform_0, window_bounds = array<i64: 16, 128>}, {transform_indices = @transform_1, window_bounds = array<i64: 128, 128>}, {transform_indices = @transform_2, window_bounds = array<i64: 1, 128>}, {transform_indices = @transform_3, window_bounds = array<i64: 16, 128>}]} {
    %c0 = arith.constant 0 : index
    %c0_0 = arith.constant 0 : index
    %0 = vector.load %arg2[%c0, %c0_0] : memref<16x128xbf16, #tpu.memory_space<vmem>>, vector<16x128xbf16>
    %c0_1 = arith.constant 0 : index
    %c0_2 = arith.constant 0 : index
    %1 = vector.load %arg3[%c0_1, %c0_2] : memref<128x128xbf16, #tpu.memory_space<vmem>>, vector<128x128xbf16>
    %cst = arith.constant dense<0.000000e+00> : vector<16x128xf32>
    %2 = tpu.matmul %0, %1, %cst {dimension_numbers = #tpu.dot_dimension_numbers<[1], [1], [0], [0], [0, 0, 1, 0], [], []>} : vector<16x128xbf16>, vector<128x128xbf16>, vector<16x128xf32> -> vector<16x128xf32>
    %c0_3 = arith.constant 0 : index
    %c0_4 = arith.constant 0 : index
    %3 = vector.load %arg4[%c0_3, %c0_4] : memref<1x128xf32, #tpu.memory_space<vmem>>, vector<1x128xf32>
    %4 = vector.broadcast %3 : vector<1x128xf32> to vector<16x128xf32>
    %5 = arith.addf %2, %4 : vector<16x128xf32>
    %cst_5 = arith.constant 0.000000e+00 : f32
    %6 = vector.broadcast %cst_5 : f32 to vector<16x128xf32>
    %7 = arith.maximumf %5, %6 : vector<16x128xf32>
    %c0_6 = arith.constant 0 : index
    %c0_7 = arith.constant 0 : index
    %8 = vector.load %arg5[%c0_6, %c0_7] : memref<16x128xf32, #tpu.memory_space<vmem>>, vector<16x128xf32>
    tpu.vector_store %arg5[%c0_6, %c0_7], %7 {strides = array<i32>} : memref<16x128xf32, #tpu.memory_space<vmem>>, vector<16x128xf32>,
    return
  }
  func.func @transform_0(%arg0: i32, %arg1: i32) -> (i32, i32) {
    %c0_i32 = arith.constant 0 : i32
    %c0_i32_0 = arith.constant 0 : i32
    return %arg0, %c0_i32 : i32, i32
  }
  func.func @transform_1(%arg0: i32, %arg1: i32) -> (i32, i32) {
    %c0_i32 = arith.constant 0 : i32
    %c0_i32_0 = arith.constant 0 : i32
    return %arg1, %c0_i32 : i32, i32
  }
  func.func @transform_2(%arg0: i32, %arg1: i32) -> (i32, i32) {
    %c0_i32 = arith.constant 0 : i32
    %c0_i32_0 = arith.constant 0 : i32
    return %c0_i32, %arg1 : i32, i32
  }
  func.func @transform_3(%arg0: i32, %arg1: i32) -> (i32, i32) {
    %c0_i32 = arith.constant 0 : i32
    return %arg0, %arg1 : i32, i32
  }
}

</mosaic_0001>

<bundles_post_ra>
// kernel: linear_relu.1
= control target key start
LH: loop header
LB: loop body
LE: loop exit
PB: predicated region body
PF: predicated region fallthrough
CT: control target
= control target key end

     0   :  { %v193_v0 = vmov 0.0   ;;  %vm194_vm0 = vmmov 0   ;;  %s251_s1 = inlined_call_operand.vmem [shape: bf16[128,128], index: 1, kind: input, shape index: {}]   ;;  %s252_s0 = inlined_call_operand.vmem [shape: bf16[16,128], index: 0, kind: input, shape index: {}]   ;;  %s253_s2 = inlined_call_operand.vmem [shape: f32[1,128], index: 2, kind: input, shape index: {}]   ;;  %s254_s3 = inlined_call_operand.vmem [shape: f32[16,128], index: 3, kind: output, shape index: {}]  }
   0x1   :  { %162 = vmatprep.subr.bf16.mxu0 %v193_v0  ;;  %v184_v1 = vld [vmem:[%s251_s1] sm:$0xff]   ;;  %178 = vmatprep.mubr.msk.bf16.mxu0 %vm194_vm0, %v193_v0  ;;  %v185_v2 = vld [vmem:[%s251_s1 + $0x8] sm:$0xff]   ;;  %v186_v3 = vld [vmem:[%s251_s1 + $0x10] sm:$0xff]  }
   0x2   :  { %163 = vmatpush3.bf16.xpose.msra.mxu0 %v184_v1  ;;  %v187_v4 = vld [vmem:[%s251_s1 + $0x18] sm:$0xff]   ;;  %v188_v5 = vld [vmem:[%s251_s1 + $0x20] sm:$0xff]   ;;  %v189_v6 = vld [vmem:[%s251_s1 + $0x28] sm:$0xff]  }
   0x3   :  { %164 = vmatprep.subr.bf16.mxu0 %v193_v0  ;;  %v190_v7 = vld [vmem:[%s251_s1 + $0x30] sm:$0xff]   ;;  %v191_v8 = vld [vmem:[%s251_s1 + $0x38] sm:$0xff]   ;;  %v192_v9 = vld [vmem:[%s252_s0] sm:$0xff]  }
   0x4   :  { %v143_v10 = vld [vmem:[%s253_s2] ss:$0 sm:$0xff] }
   0xa   :  { %165 = vmatpush3.bf16.xpose.msra.mxu0 %v185_v2 }
   0xb   :  { %166 = vmatprep.subr.bf16.mxu0 %v193_v0 }
  0x12   :  { %167 = vmatpush3.bf16.xpose.msra.mxu0 %v186_v3 }
  0x13   :  { %168 = vmatprep.subr.bf16.mxu0 %v193_v0 }
  0x1a   :  { %169 = vmatpush3.bf16.xpose.msra.mxu0 %v187_v4 }
  0x1b   :  { %170 = vmatprep.subr.bf16.mxu0 %v193_v0 }
  0x22   :  { %171 = vmatpush3.bf16.xpose.msra.mxu0 %v188_v5 }
  0x23   :  { %172 = vmatprep.subr.bf16.mxu0 %v193_v0 }
  0x2a   :  { %173 = vmatpush3.bf16.xpose.msra.mxu0 %v189_v6 }
  0x2b   :  { %174 = vmatprep.subr.bf16.mxu0 %v193_v0 }
  0x32   :  { %175 = vmatpush3.bf16.xpose.msra.mxu0 %v190_v7 }
  0x33   :  { %176 = vmatprep.subr.bf16.mxu0 %v193_v0 }
  0x3a   :  { %177 = vmatpush3.bf16.xpose.msra.mxu0 %v191_v8 }
  0x41   :  { %179 = vmatmul.mubr.bf16.vlgmr.msra.gmra.mrb[0].mxu0 %v192_v9 }
 0x114   :  { %v128_v11 = vpop.f32.mrb[0].mxu0 }
 0x115   :  { %v129_v12 = vadd.f32 %v143_v10, %v128_v11  ;;  %v180_v13 = vpop.f32.mrb[1].mxu0 }
 0x116   :  { %v131_v14 = vpop.f32.mrb[2].mxu0 }
 0x117   :  { %v135_v15 = vmax.f32 %v129_v12, 0.0  ;;  %v132_v16 = vadd.f32 %v143_v10, %v131_v14  ;;  %v181_v17 = vpop.f32.mrb[3].mxu0 }
 0x119   :  { %137 = vst [vmem:[%s254_s3] sm:$0xff] %v135_v15  ;;  %v136_v18 = vmax.f32 %v132_v16, 0.0 }
 0x11b   :  { %138 = vst [vmem:[%s254_s3 + $0x8] sm:$0xff] %v136_v18 }

</bundles_post_ra>
